<compile_context>
chip_gen: v7x
topology: tpu7x:2x2x1
jax: 0.10.0
libtpu: 0.0.40
codegen_flags: <defaults>
</compile_context>

<pallas_src>
import jax
import jax.numpy as jnp
from jax import lax
from jax.experimental import pallas as pl
from jax.experimental.pallas import tpu as pltpu


def _round_up(x: int, m: int) -> int:
    return (x + m - 1) // m * m


def _pad2d(arr, rows, cols):
    """Zero-pad a 2-D array up to (rows, cols); no-op when already aligned."""
    pr = rows - arr.shape[0]
    pc = cols - arr.shape[1]
    if pr or pc:
        arr = jnp.pad(arr, ((0, pr), (0, pc)))
    return arr


def _plan_tiles(m, k_dim, n_dim, tm, tn, tk):
    """Clamp tiles to the (padded) problem and keep >= 2 parallel output tiles."""
    tm = min(tm, _round_up(m, 8))
    tk = min(tk, _round_up(k_dim, 128))
    tn = min(tn, _round_up(n_dim, 128))
    m_p = _round_up(m, tm)
    k_p = _round_up(k_dim, tk)
    n_p = _round_up(n_dim, tn)
    # v7x has 2 TensorCores sharded over the "parallel" grid axes: make sure
    # there are at least two (i, j) output tiles whenever the problem allows.
    for _ in range(8):
        if (m_p // tm) * (n_p // tn) >= 2:
            break
        if tn > 128:
            tn = max(128, (tn // 2) // 128 * 128)
            n_p = _round_up(n_dim, tn)
        elif tm > 8:
            tm = max(8, (tm // 2) // 8 * 8)
            m_p = _round_up(m, tm)
        else:
            break
    return tm, tn, tk, m_p, k_p, n_p


def _vmem_limit(requested_bytes):
    """Tile footprint + headroom, clamped to the chip's physical VMEM."""
    try:
        cap = pltpu.get_tpu_info().vmem_capacity_bytes
    except Exception:
        cap = 64 << 20  # conservative default: v7x per-TensorCore VMEM
    return int(max(min(requested_bytes + (8 << 20), cap - (8 << 20)), 16 << 20))


# --------------------------------------------------------------------------
# Kernels
# --------------------------------------------------------------------------
def _lora_down_kernel(x_ref, a_ref, xa_ref, acc_ref):
    """xa = x @ A^T over an (M, K) grid. A stays in native (r_pad, K) layout."""
    k = pl.program_id(1)

    @pl.when(k == 0)
    def _init():
        acc_ref[...] = jnp.zeros_like(acc_ref)

    acc_ref[...] += lax.dot_general(
        x_ref[...], a_ref[...],
        dimension_numbers=(((1,), (1,)), ((), ())),
        preferred_element_type=jnp.float32)

    @pl.when(k == pl.num_programs(1) - 1)
    def _store():
        xa_ref[...] = acc_ref[...].astype(xa_ref.dtype)


def _lora_linear_kernel(x_ref, xa_ref, w_ref, bias_ref, lb_ref, o_ref, acc_ref):
    """y = x @ W^T + bias + xa @ (scale*B)^T over an (M, N, K) grid."""
    k = pl.program_id(2)

    @pl.when(k == 0)
    def _init():
        acc_ref[...] = jnp.zeros_like(acc_ref)

    # Base matmul: x (tm, tk) contracted with W (tn, tk) on their last dims;
    # the MXU consumes the (N, K) weight layout natively -- no transpose.
    acc_ref[...] += lax.dot_general(
        x_ref[...], w_ref[...],
        dimension_numbers=(((1,), (1,)), ((), ())),
        preferred_element_type=jnp.float32)

    @pl.when(k == pl.num_programs(2) - 1)
    def _epilogue():
        # Rank-r "up" projection (scale already folded into lb), bias add,
        # single lane-dense store per output tile.
        lora = lax.dot_general(
            xa_ref[...], lb_ref[...],
            dimension_numbers=(((1,), (1,)), ((), ())),
            preferred_element_type=jnp.float32)
        o_ref[...] = (acc_ref[...] + bias_ref[...] + lora).astype(o_ref.dtype)


def _base_linear_kernel(x_ref, w_ref, bias_ref, o_ref, acc_ref):
    """y = x @ W^T + bias  (merged-weight fast path for frozen adapters)."""
    k = pl.program_id(2)

    @pl.when(k == 0)
    def _init():
        acc_ref[...] = jnp.zeros_like(acc_ref)

    acc_ref[...] += lax.dot_general(
        x_ref[...], w_ref[...],
        dimension_numbers=(((1,), (1,)), ((), ())),
        preferred_element_type=jnp.float32)

    @pl.when(k == pl.num_programs(2) - 1)
    def _epilogue():
        o_ref[...] = (acc_ref[...] + bias_ref[...]).astype(o_ref.dtype)


# --------------------------------------------------------------------------
# Wrappers
# --------------------------------------------------------------------------
def _lora_down(x_pad, a_pad, *, tm, tk, out_dtype):
    """Pre-pass: xa = x @ A^T, output lane-dense (m_p, r_pad)."""
    m_p, k_p = x_pad.shape
    r_pad = a_pad.shape[0]
    grid = (m_p // tm, k_p // tk)
    itemsize = jnp.dtype(x_pad.dtype).itemsize
    vmem = 2 * itemsize * (tm * tk + r_pad * tk + tm * r_pad) + 4 * tm * r_pad
    return pl.pallas_call(
        _lora_down_kernel,
        out_shape=jax.ShapeDtypeStruct((m_p, r_pad), out_dtype),
        grid_spec=pltpu.PrefetchScalarGridSpec(
            num_scalar_prefetch=0,
            grid=grid,
            in_specs=[
                pl.BlockSpec((tm, tk), lambda i, k: (i, k)),       # x
                pl.BlockSpec((r_pad, tk), lambda i, k: (0, k)),    # A (r_pad, in)
            ],
            out_specs=pl.BlockSpec((tm, r_pad), lambda i, k: (i, 0)),
            scratch_shapes=[pltpu.VMEM((tm, r_pad), jnp.float32)],
        ),
        compiler_params=pltpu.CompilerParams(
            dimension_semantics=("parallel", "arbitrary"),
            vmem_limit_bytes=_vmem_limit(vmem),
        ),
    )(x_pad, a_pad)


def lora_linear(x, base_w, base_b, lora_a, lora_b, *, r=8, alpha=16,
                dropout_p=0.0, tm=512, tn=512, tk=1024,
                compute_dtype=None, merge_weights=False):
    """y = x @ W^T + b + (alpha/r) * (x @ A^T) @ B^T   (dropout_p == 0)."""
    assert dropout_p == 0.0, "TODO(synk): nonzero dropout needs pltpu.prng_* masking"
    out_features, in_features = base_w.shape
    assert lora_a.shape == (r, in_features)
    assert lora_b.shape == (out_features, r)

    lead = x.shape[:-1]
    m = 1
    for d in lead:
        m *= d
    x2d = x.reshape(m, in_features)
    scale = float(alpha) / float(r)
    cdt = jnp.dtype(compute_dtype) if compute_dtype is not None else jnp.dtype(x.dtype)

    tm, tn, tk, m_p, k_p, n_p = _plan_tiles(m, in_features, out_features, tm, tn, tk)
    grid = (m_p // tm, n_p // tn, k_p // tk)

    x_pad = _pad2d(x2d, m_p, k_p).astype(cdt)
    bias2d = _pad2d(base_b.astype(jnp.float32).reshape(1, out_features), 1, n_p)

    itemsize = jnp.dtype(cdt).itemsize
    out_itemsize = jnp.dtype(x.dtype).itemsize
    out_dtype = x.dtype

    if merge_weights:
        # Frozen-adapter fast path: W_eff = W + (alpha/r) * B @ A (in real use,
        # computed once at setup and cached; shown here for completeness).
        w_eff = base_w + jnp.asarray(scale, base_w.dtype) * (lora_b @ lora_a)
        w_pad = _pad2d(w_eff, n_p, k_p).astype(cdt)

        vmem = (2 * itemsize * (tm * tk + tn * tk) + 2 * 4 * tn
                + 2 * out_itemsize * tm * tn + 4 * tm * tn)
        flops = 2 * m * out_features * in_features
        bytes_accessed = (itemsize * (m * in_features + out_features * in_features)
                          + 4 * out_features + out_itemsize * m * out_features)
        out = pl.pallas_call(
            _base_linear_kernel,
            out_shape=jax.ShapeDtypeStruct((m_p, n_p), out_dtype),
            grid_spec=pltpu.PrefetchScalarGridSpec(
                num_scalar_prefetch=0,
                grid=grid,
                in_specs=[
                    pl.BlockSpec((tm, tk), lambda i, j, k: (i, k)),    # x
                    pl.BlockSpec((tn, tk), lambda i, j, k: (j, k)),    # W_eff (out, in)
                    pl.BlockSpec((1, tn), lambda i, j, k: (0, j)),     # bias (f32)
                ],
                out_specs=pl.BlockSpec((tm, tn), lambda i, j, k: (i, j)),
                scratch_shapes=[pltpu.VMEM((tm, tn), jnp.float32)],
            ),
            compiler_params=pltpu.CompilerParams(
                dimension_semantics=("parallel", "parallel", "arbitrary"),
                vmem_limit_bytes=_vmem_limit(vmem),
            ),
            cost_estimate=pl.CostEstimate(flops=flops, transcendentals=0,
                                          bytes_accessed=bytes_accessed),
        )(x_pad, w_pad, bias2d)
    else:
        r_pad = _round_up(r, 128)
        w_pad = _pad2d(base_w, n_p, k_p).astype(cdt)          # native (out, in)
        a_pad = _pad2d(lora_a, r_pad, k_p).astype(cdt)        # native (r, in), r -> 128
        lb_scaled = lora_b * jnp.asarray(scale, lora_b.dtype)  # fold alpha/r into B
        lb_pad = _pad2d(lb_scaled, n_p, r_pad).astype(cdt)    # native (out, r), r -> 128

        # Hoisted rank-r down-projection (once per forward, not per (i, j, k)).
        xa = _lora_down(x_pad, a_pad, tm=tm, tk=tk, out_dtype=cdt)  # (m_p, r_pad)

        vmem = (2 * itemsize * (tm * tk + tn * tk + tm * r_pad + tn * r_pad)
                + 2 * 4 * tn + 2 * out_itemsize * tm * tn + 4 * tm * tn)
        flops = (2 * m * out_features * in_features
                 + 2 * m * out_features * r_pad)
        bytes_accessed = (itemsize * (m * in_features + out_features * in_features
                                      + m * r_pad + out_features * r_pad)
                          + 4 * out_features + out_itemsize * m * out_features)
        out = pl.pallas_call(
            _lora_linear_kernel,
            out_shape=jax.ShapeDtypeStruct((m_p, n_p), out_dtype),
            grid_spec=pltpu.PrefetchScalarGridSpec(
                num_scalar_prefetch=0,
                grid=grid,
                in_specs=[
                    pl.BlockSpec((tm, tk), lambda i, j, k: (i, k)),      # x
                    pl.BlockSpec((tm, r_pad), lambda i, j, k: (i, 0)),   # xa = x @ A^T
                    pl.BlockSpec((tn, tk), lambda i, j, k: (j, k)),      # W (out, in)
                    pl.BlockSpec((1, tn), lambda i, j, k: (0, j)),       # bias (f32)
                    pl.BlockSpec((tn, r_pad), lambda i, j, k: (j, 0)),   # scale*B (out, r)
                ],
                out_specs=pl.BlockSpec((tm, tn), lambda i, j, k: (i, j)),
                scratch_shapes=[pltpu.VMEM((tm, tn), jnp.float32)],
            ),
            compiler_params=pltpu.CompilerParams(
                dimension_semantics=("parallel", "parallel", "arbitrary"),
                vmem_limit_bytes=_vmem_limit(vmem),
            ),
            cost_estimate=pl.CostEstimate(flops=flops, transcendentals=0,
                                          bytes_accessed=bytes_accessed),
        )(x_pad, xa, w_pad, bias2d, lb_pad)

    out = out[:m, :out_features]
    return out.reshape(*lead, out_features)


def lora_linear_ref(x, base_w, base_b, lora_a, lora_b, *, r=8, alpha=16):
    scale = alpha / r
    base = x @ base_w.T + base_b
    lora = (x @ lora_a.T) @ lora_b.T
    return base + scale * lora


if __name__ == "__main__":
    key = jax.random.PRNGKey(0)
    k_x, k_w, k_b, k_a, k_lb = jax.random.split(key, 5)

    batch, seq = 2, 8
    in_features, out_features, r, alpha = 32, 32, 8, 16
    dtype = jnp.float32

    # Deterministic "init": base Linear weight/bias, LoRA A ~ N(0, 0.02).
    # lora_b initialized as in test_mode=True so the LoRA path is exercised
    # (the default test_mode=False zero-init would make the LoRA term a no-op).
    x = jax.random.normal(k_x, (batch, seq, in_features), dtype=dtype)
    base_w = jax.random.normal(k_w, (out_features, in_features), dtype=dtype) * 0.1
    base_b = jax.random.normal(k_b, (out_features,), dtype=dtype) * 0.1
    lora_a = jax.random.normal(k_a, (r, in_features), dtype=dtype) * 0.02
    lora_b = jax.random.normal(k_lb, (out_features, r), dtype=dtype) * 0.02

    ref = lora_linear_ref(x, base_w, base_b, lora_a, lora_b, r=r, alpha=alpha)

    # Fused LoRA kernel (separate adapter weights).
    out = lora_linear(x, base_w, base_b, lora_a, lora_b, r=r, alpha=alpha)
    out = jax.block_until_ready(out)
    assert out.shape == (batch, seq, out_features)
    assert jnp.allclose(out, ref, atol=1e-4, rtol=1e-4), "fused kernel mismatch"

    # Merged-weight fast path (frozen adapter / inference).
    out_m = lora_linear(x, base_w, base_b, lora_a, lora_b, r=r, alpha=alpha,
                        merge_weights=True)
    out_m = jax.block_until_ready(out_m)
    assert jnp.allclose(out_m, ref, atol=1e-4, rtol=1e-4), "merged kernel mismatch"

    print("KERNEL_OK")
</pallas_src>

<mosaic_0001>
module attributes {stable_mosaic.version = 11 : i64} {
  func.func @_lora_down_kernel(%arg0: i32, %arg1: i32, %arg2: memref<8x128xf32, #tpu.memory_space<vmem>>, %arg3: memref<128x128xf32, #tpu.memory_space<vmem>>, %arg4: memref<8x128xf32, #tpu.memory_space<vmem>>, %arg5: memref<8x128xf32, #tpu.memory_space<vmem>>) attributes {dimension_semantics = [#tpu.dimension_semantics<parallel>, #tpu.dimension_semantics<arbitrary>], iteration_bounds = array<i64: 2, 1>, scalar_prefetch = 0 : i64, scratch_operands = 1 : i64, tpu.core_type = #tpu.core_type<tc>, window_params = [{transform_indices = @transform_0, window_bounds = array<i64: 8, 128>}, {transform_indices = @transform_1, window_bounds = array<i64: 128, 128>}, {transform_indices = @transform_2, window_bounds = array<i64: 8, 128>}]} {
    %c0_i32 = arith.constant 0 : i32
    %0 = arith.cmpi eq, %arg1, %c0_i32 : i32
    %1 = arith.extui %0 : i1 to i32
    %c0_i32_0 = arith.constant 0 : i32
    %2 = arith.cmpi ne, %1, %c0_i32_0 : i32
    scf.if %2 {
      %cst_10 = arith.constant 0.000000e+00 : f32
      %12 = vector.broadcast %cst_10 : f32 to vector<8x128xf32>
      %c0_11 = arith.constant 0 : index
      %c0_12 = arith.constant 0 : index
      %13 = vector.load %arg5[%c0_11, %c0_12] : memref<8x128xf32, #tpu.memory_space<vmem>>, vector<8x128xf32>
      tpu.vector_store %arg5[%c0_11, %c0_12], %12 {strides = array<i32>} : memref<8x128xf32, #tpu.memory_space<vmem>>, vector<8x128xf32>,
    } else {
    }
    %c0 = arith.constant 0 : index
    %c0_1 = arith.constant 0 : index
    %3 = vector.load %arg5[%c0, %c0_1] : memref<8x128xf32, #tpu.memory_space<vmem>>, vector<8x128xf32>
    %c0_2 = arith.constant 0 : index
    %c0_3 = arith.constant 0 : index
    %4 = vector.load %arg2[%c0_2, %c0_3] : memref<8x128xf32, #tpu.memory_space<vmem>>, vector<8x128xf32>
    %c0_4 = arith.constant 0 : index
    %c0_5 = arith.constant 0 : index
    %5 = vector.load %arg3[%c0_4, %c0_5] : memref<128x128xf32, #tpu.memory_space<vmem>>, vector<128x128xf32>
    %cst = arith.constant dense<0.000000e+00> : vector<8x128xf32>
    %6 = tpu.matmul %4, %5, %cst {dimension_numbers = #tpu.dot_dimension_numbers<[1], [1], [0], [0], [0, 0, 1, 0], [], []>} : vector<8x128xf32>, vector<128x128xf32>, vector<8x128xf32> -> vector<8x128xf32>
    %7 = arith.addf %3, %6 : vector<8x128xf32>
    %c0_6 = arith.constant 0 : index
    %c0_7 = arith.constant 0 : index
    %8 = vector.load %arg5[%c0_6, %c0_7] : memref<8x128xf32, #tpu.memory_space<vmem>>, vector<8x128xf32>
    tpu.vector_store %arg5[%c0_6, %c0_7], %7 {strides = array<i32>} : memref<8x128xf32, #tpu.memory_space<vmem>>, vector<8x128xf32>,
    %c0_i32_8 = arith.constant 0 : i32
    %9 = arith.cmpi eq, %arg1, %c0_i32_8 : i32
    %10 = arith.extui %9 : i1 to i32
    %c0_i32_9 = arith.constant 0 : i32
    %11 = arith.cmpi ne, %10, %c0_i32_9 : i32
    scf.if %11 {
      %c0_10 = arith.constant 0 : index
      %c0_11 = arith.constant 0 : index
      %12 = vector.load %arg5[%c0_10, %c0_11] : memref<8x128xf32, #tpu.memory_space<vmem>>, vector<8x128xf32>
      %c0_12 = arith.constant 0 : index
      %c0_13 = arith.constant 0 : index
      %13 = vector.load %arg4[%c0_12, %c0_13] : memref<8x128xf32, #tpu.memory_space<vmem>>, vector<8x128xf32>
      tpu.vector_store %arg4[%c0_12, %c0_13], %12 {strides = array<i32>} : memref<8x128xf32, #tpu.memory_space<vmem>>, vector<8x128xf32>,
    } else {
    }
    return
  }
  func.func @transform_0(%arg0: i32, %arg1: i32) -> (i32, i32) {
    %c0_i32 = arith.constant 0 : i32
    return %arg0, %arg1 : i32, i32
  }
  func.func @transform_1(%arg0: i32, %arg1: i32) -> (i32, i32) {
    %c0_i32 = arith.constant 0 : i32
    %c0_i32_0 = arith.constant 0 : i32
    return %c0_i32, %arg1 : i32, i32
  }
  func.func @transform_2(%arg0: i32, %arg1: i32) -> (i32, i32) {
    %c0_i32 = arith.constant 0 : i32
    %c0_i32_0 = arith.constant 0 : i32
    return %arg0, %c0_i32 : i32, i32
  }
}

</mosaic_0001>

<bundles_post_ra>
// kernel: tpu_custom_call.1
= control target key start
LH: loop header
LB: loop body
LE: loop exit
PB: predicated region body
PF: predicated region fallthrough
CT: control target
= control target key end

     0   :  { %7 = vsyncpa [#allocation4], 0  ;;  %s960_s0 = inlined_call_operand.hbm [shape: f32[16,128], index: 0, kind: input, shape index: {}]   ;;  %s961_s1 = inlined_call_operand.hbm [shape: f32[128,128], index: 1, kind: input, shape index: {}]   ;;  %s962_s2 = inlined_call_operand.hbm [shape: f32[16,128], index: 2, kind: output, shape index: {}]  }
   0x1   :  { %9 = vsyncpa [#allocation4 + $0x1], 0 }
   0x2   :  { %10 = vsyncpa [#allocation7], 0 }
   0x3   :  { %11 = vsyncpa [#allocation5], 0 }
   0x4   :  { %13 = vsyncpa [#allocation5 + $0x1], 0  ;;  %s739_s9 = smov 0   ;;  %s741_s10 = smov 0  }
   0x5   :  { %s743_s11 = smov 0   ;;  %s745_s12 = smov 0  }
   0x6   :  { %s747_s13 = smov 0   ;;  %s749_s14 = smov 0  }
   0x7 LB: > { %s401_s15 = sadd.s32 4294967295, %s714_s14   ;;  %s402_s16 = sadd.s32 4294967294, %s714_s14   ;;  %s714_s14 = sphi %s749_s14, %s19_s14   ;;  %s710_s13 = sphi %s747_s13, %s986_s13   ;;  %s706_s12 = sphi %s745_s12, %s985_s12   ;;  %s702_s11 = sphi %s743_s11, %s984_s11   ;;  %s698_s10 = sphi %s741_s10, %s983_s10   ;;  %s694_s9 = sphi %s739_s9, %s982_s9  }
   0x8   : > { %p53_p0 = scmp.ne.s32.totalorder %s698_s10, %s694_s9  ;;  %p773_p1 = scmp.eq.s32.totalorder %s401_s15, 0 }
   0x9   : > { %p777_p2 = scmp.eq.s32.totalorder %s401_s15, 1  ;;  %p109_p3 = scmp.eq.s32.totalorder %s402_s16, 1 }
   0xa   : > { %s967_s17 = scalar_select %p773_p1, 1, 0 }
   0xb   : > { %s968_s18 = scalar_select %p777_p2, 1, 0 }
   0xc   : > { %p783_p4 = por %p773_p1, %p53_p0  ;;  %p403_p5 = scmp.ge.s32.totalorder %s714_s14, 1 }
   0xd   : > { %p788_p6 = por %p109_p3, %p53_p0  ;;  %p116_p7 = scmp.lt.s32.totalorder %s714_s14, 3 }
   0xe   : > { %s969_s19 = scalar_select %p783_p4, 1, 0 }
   0xf   : > { %s970_s20 = scalar_select %p788_p6, 1, 0 }
  0x10   : > { %p793_p8 = pnand %p403_p5, %p116_p7  ;;  %s716_s22 = smov [#allocation6]  }
  0x11   : > { %s130_s23 = sshll.u32 %s716_s22, 4  ;;  %s31_s25 = sadd.s32 1, %s710_s13  ;;  %s131_s23 = int_to_ptr.vmem [resolvable:$true] %s130_s23 }
  0x12   : > { %s971_s21 = scalar_select %p793_p8, 1, 0 }
  0x13   : > { %p500_p9 = pneg %p793_p8  ;;  %s570_s28 = scalar_lea.hbm %s961_s1, 2048 }
  0x14   : > { %p571_p12 = scmp.ne.s32.totalorder %s961_s1, %s570_s28  ;;  %p577_p5 = scmp.lt.u32.totalorder %s570_s28, %s961_s1 }
  0x15   : > { %p802_p11 = pnand %p500_p9, %p773_p1 }
  0x17   : > { %p572_p13 = pneg %p802_p11 }
  0x19   : > { %p573_p0 = pnand %p572_p13, %p571_p12 }
  0x1b   : > { %p574_p3 = pneg %p573_p0 }
  0x1d   : > { %p579_p7 = pnand %p577_p5, %p574_p3 }
  0x1f   : > { %582 = shalt.err (!%p579_p7)
}
  0x20   : > { %s583_s5 = scalar_lea.vmem %s131_s23, 2048  ;;  %p591_p1 = scmp.lt.s32.totalorder %s131_s23, %s131_s23 }
  0x21   : > { %p584_p9 = scmp.ne.s32.totalorder %s131_s23, %s583_s5  ;;  %p592_p4 = scmp.lt.s32.totalorder %s583_s5, %s583_s5 }
  0x23   : > { %p586_p10 = pnand %p584_p9, %p572_p13  ;;  %p593_p8 = por %p592_p4, %p591_p1 }
  0x25   : > { %p587_p6 = pneg %p586_p10 }
  0x27   : > { %p594_p2 = pnand %p593_p8, %p587_p6 }
  0x29   : > { %597 = shalt.err (!%p594_p2)
}
  0x2a   : > { %s717_s6 = smov 128   ;;  %s718_s7 = smov 8  }
  0x2b   : > { %503 = dma.hbm_to_vmem [thread:$0]  (!%p802_p11), %s961_s1, 2048, %s131_s23, [#allocation7], %s717_s6, %s717_s6, %s718_s7  }
  0x2c   : > { %p33_p1 = scmp.ge.s32.totalorder %s31_s25, 2  ;;  %s40_s16 = sadd.s32 1, %s702_s11 }
  0x2d   : > { %p47_p2 = scmp.ne.s32.totalorder %s702_s11, %s698_s10  ;;  %p48_p4 = scmp.eq.s32.totalorder %s714_s14, 0 }
  0x2e   : > { %s988_s25 = smov (%p33_p1, %s31_s25), 0  ;;  %p974_p8 = scmp.ne.s32.totalorder %s968_s18, 0 }
  0x2f   : > { %p829_p6 = por %p48_p4, %p47_p2  ;;  %s35_s24 = ssub.s32 %s710_s13, %s988_s25 }
  0x30   : > { %p835_p10 = por %p974_p8, %p47_p2  ;;  %p513_p12 = scmp.lt.s32.totalorder %s714_s14, 2 }
  0x31   : > { %p38_p11 = scmp.eq.s32.totalorder %s35_s24, 0  ;;  %s144_s23 = sand.u32 1, %s702_s11  }
  0x32   : > { %s406_s27 = sshll.u32 %s144_s23, 3  ;;  %s407_s29 = sshll.u32 %s710_s13, 7 }
  0x33   : > { %s844_s28 = scalar_select %p38_p11, %s702_s11, %s40_s16  }
  0x34   : > { %s850_s4 = scalar_lea.hbm %s960_s0, %s407_s29  ;;  %s148_s18 = scalar_lea.vmem [#allocation3], %s406_s27 }
  0x35   : > { %s156_s5 = sshll.u32 %s148_s18, 4  ;;  %p856_p13 = pnand %p513_p12, %p829_p6  ;;  %s852_s5 = int_to_ptr.vmem [resolvable:$true] %s156_s5 }
  0x36   : > { %s145_s7 = scalar_lea.sflag [#allocation4], %s144_s23  ;;  %s598_s8 = scalar_lea.hbm %s850_s4, 128 }
  0x37   : > { %p599_p0 = scmp.ne.s32.totalorder %s850_s4, %s598_s8  ;;  %p600_p3 = pneg %p856_p13 }
  0x38   : > { %s603_s24 = scalar_lea.hbm %s960_s0, 256  ;;  %p604_p9 = scmp.lt.u32.totalorder %s850_s4, %s960_s0 }
  0x39   : > { %p601_p5 = pnand %p600_p3, %p599_p0  ;;  %p605_p1 = scmp.lt.u32.totalorder %s603_s24, %s598_s8 }
  0x3a   : > { %p607_p4 = scmp.lt.u32.totalorder %s598_s8, %s850_s4 }
  0x3b   : > { %p602_p7 = pneg %p601_p5  ;;  %p606_p2 = por %p605_p1, %p604_p9 }
  0x3d   : > { %p608_p6 = por %p607_p4, %p606_p2 }
  0x3f   : > { %p609_p8 = pnand %p608_p6, %p602_p7 }
  0x41   : > { %612 = shalt.err (!%p609_p8)
}
  0x42   : > { %s613_s23 = scalar_lea.vmem %s852_s5, 128  ;;  %s719_s29 = smov [#allocation3]  }
  0x43   : > { %p614_p12 = scmp.ne.s32.totalorder %s852_s5, %s613_s23  ;;  %s618_s30 = sshll.u32 %s719_s29, 4  ;;  %s619_s30 = int_to_ptr.vmem [resolvable:$false] %s618_s30 }
  0x44   : > { %s620_s3 = scalar_lea.vmem %s619_s30, 256  ;;  %p621_p5 = scmp.lt.s32.totalorder %s852_s5, %s619_s30 }
  0x45   : > { %p616_p11 = pnand %p614_p12, %p600_p3  ;;  %p622_p9 = scmp.lt.s32.totalorder %s620_s3, %s613_s23 }
  0x47   : > { %p617_p0 = pneg %p616_p11  ;;  %p623_p1 = por %p622_p9, %p621_p5 }
  0x49   : > { %p624_p2 = pnand %p623_p1, %p617_p0 }
  0x4b   : > { %627 = shalt.err (!%p624_p2)
}
  0x4c   : > { %507 = dma.hbm_to_vmem [thread:$0]  (!%p856_p13), %s850_s4, 128, %s852_s5, %s145_s7  }
  0x4d   : > { %p977_p7 = scmp.ne.s32.totalorder %s971_s21, 0 }
  0x4e   : > { %s888_s18 = sand.u32 (!%p977_p7), 1, %s698_s10   ;;  %p978_p3 = scmp.ne.s32.totalorder (!%p977_p7), %s969_s19, 0 }
  0x4f   : > { %165 = sbr.rel (%p977_p7) target bundleno = 383 (0x17f), region = 28  ;;  %s409_s8 = sshll.u32 (!%p977_p7), %s888_s18, 3 }
  0x50   : > { %s168_s15 = scalar_lea.sflag (!%p977_p7), [#allocation4], %s888_s18  ;;  %s894_s16 = scalar_lea.vmem (!%p977_p7), [#allocation3], %s409_s8 }
  0x56   : > { %681 = dma.done.wait (%p978_p3), %s168_s15, 128  }
  0x57   : > { %683 = vsyncadd (%p978_p3), %s168_s15, 4294967168  ;;  %p979_p13 = scmp.ne.s32.totalorder %s967_s17, 0 }
  0x59   : > { %685 = dma.done.wait (%p979_p13), [#allocation7], 2048  }
  0x5a   : > { %687 = vsyncadd (%p979_p13), [#allocation7], 4294965248  ;;  %v720_v0 = vmov 0.0|0.0   ;;  %vm721_vm0 = vmmov 0   ;;  %v722_v1 = vmov 0.0   ;;  %v203_v2 = vld [vmem:[#allocation6] sm:$0xff] }
  0x5b   : > { %468 = vmatprep.subr.bf16.mxu0 %v720_v0  ;;  %465 = vmatprep.mubr.msk.f32.mxu0 %vm721_vm0, %v722_v1  ;;  %v204_v3 = vld [vmem:[#allocation6 + $0x8] sm:$0xff]  ;;  %v205_v5 = vld [vmem:[#allocation6 + $0x10] sm:$0xff]  ;;  %v206_v6 = vld [vmem:[#allocation6 + $0x18] sm:$0xff]  ;;  %s195_s17 = scalar_lea.vmem [#allocation8], %s409_s8  ;;  %s413_s21 = sshll.u32 %s706_s12, 7 }
  0x5c   : > { %v469_v4 = vpack.c.bf16 %v204_v3, %v203_v2  ;;  %v472_v7 = vpack.c.bf16 %v206_v6, %v205_v5  ;;  %v207_v8 = vld [vmem:[#allocation6 + $0x20] sm:$0xff]  ;;  %v208_v9 = vld [vmem:[#allocation6 + $0x28] sm:$0xff]  ;;  %v209_v11 = vld [vmem:[#allocation6 + $0x30] sm:$0xff]  ;;  %s310_s19 = sshll.u32 %s195_s17, 4  ;;  %s913_s6 = scalar_lea.hbm %s962_s2, %s413_s21  ;;  %s908_s19 = int_to_ptr.vmem [resolvable:$true] %s310_s19 }
  0x5d   : > { %v475_v10 = vpack.c.bf16 %v208_v9, %v207_v8  ;;  %v210_v12 = vld [vmem:[#allocation6 + $0x38] sm:$0xff]  ;;  %v211_v14 = vld [vmem:[#allocation6 + $0x40] sm:$0xff]  ;;  %v212_v15 = vld [vmem:[#allocation6 + $0x48] sm:$0xff]  ;;  %s297_s7 = scalar_lea.sflag [#allocation5], %s888_s18  ;;  %s628_s24 = scalar_lea.vmem %s908_s19, 128 }
  0x5e   : > { %470 = vmatpush3.bf16.xpose.msra.mxu0 %v469_v4  ;;  %v478_v13 = vpack.c.bf16 %v210_v12, %v209_v11  ;;  %v481_v16 = vpack.c.bf16 %v212_v15, %v211_v14  ;;  %v213_v17 = vld [vmem:[#allocation6 + $0x50] sm:$0xff]  ;;  %v214_v18 = vld [vmem:[#allocation6 + $0x58] sm:$0xff]  ;;  %v215_v20 = vld [vmem:[#allocation6 + $0x60] sm:$0xff]  ;;  %p629_p4 = scmp.ne.s32.totalorder %s908_s19, %s628_s24  ;;  %s723_s12 = smov [#allocation8]  }
  0x5f   : > { %471 = vmatprep.subr.bf16.mxu0 %v720_v0  ;;  %v484_v19 = vpack.c.bf16 %v214_v18, %v213_v17  ;;  %v216_v21 = vld [vmem:[#allocation6 + $0x68] sm:$0xff]  ;;  %v217_v23 = vld [vmem:[#allocation6 + $0x70] sm:$0xff]  ;;  %v218_v24 = vld [vmem:[#allocation6 + $0x78] sm:$0xff]  ;;  %s632_s22 = sshll.u32 %s723_s12, 4  ;;  %s633_s22 = int_to_ptr.vmem [resolvable:$false] %s632_s22 }
  0x60   : > { %v487_v22 = vpack.c.bf16 %v216_v21, %v215_v20  ;;  %v490_v25 = vpack.c.bf16 %v218_v24, %v217_v23  ;;  %v202_v26 = vld [vmem:[%s894_s16] sm:$0xff]  ;;  %p630_p6 = pnand %p629_p4, %p835_p10  ;;  %s634_s27 = scalar_lea.vmem %s633_s22, 256 }
  0x61   : > { %p635_p12 = scmp.lt.s32.totalorder %s908_s19, %s633_s22  ;;  %p636_p11 = scmp.lt.s32.totalorder %s634_s27, %s628_s24 }
  0x62   : > { %p631_p8 = pneg %p630_p6 }
  0x63   : > { %p637_p0 = por %p636_p11, %p635_p12 }
  0x65   : > { %p638_p5 = pnand %p637_p0, %p631_p8 }
  0x66   : > { %473 = vmatpush3.bf16.xpose.msra.mxu0 %v472_v7 }
  0x67   : > { %474 = vmatprep.subr.bf16.mxu0 %v720_v0 }
  0x6e   : > { %476 = vmatpush3.bf16.xpose.msra.mxu0 %v475_v10 }
  0x6f   : > { %477 = vmatprep.subr.bf16.mxu0 %v720_v0 }
  0x76   : > { %479 = vmatpush3.bf16.xpose.msra.mxu0 %v478_v13 }
  0x77   : > { %480 = vmatprep.subr.bf16.mxu0 %v720_v0 }
  0x7e   : > { %482 = vmatpush3.bf16.xpose.msra.mxu0 %v481_v16 }
  0x7f   : > { %483 = vmatprep.subr.bf16.mxu0 %v720_v0 }
  0x86   : > { %485 = vmatpush3.bf16.xpose.msra.mxu0 %v484_v19 }
  0x87   : > { %486 = vmatprep.subr.bf16.mxu0 %v720_v0 }
  0x8e   : > { %488 = vmatpush3.bf16.xpose.msra.mxu0 %v487_v22 }
  0x8f   : > { %489 = vmatprep.subr.bf16.mxu0 %v720_v0 }
  0x96   : > { %491 = vmatpush3.bf16.xpose.msra.mxu0 %v490_v25 }
  0x9d   : > { %466 = vmatmul.mubr.f32.vlgmr.msra.gmra.mrb[0].mxu0 %v202_v26 }
 0x170   : > { %v285_v27 = vpop.f32.mrb[0].mxu0 }
 0x171   : > { %295 = vst [vmem:[%s195_s17] sm:$0xff] %v285_v27  ;;  %v467_v28 = vpop.f32.mrb[1].mxu0 }
 0x172   : > { %641 = shalt.err (!%p638_p5)
}
 0x173   : > { %s642_s23 = scalar_lea.hbm %s913_s6, 128  ;;  %s646_s3 = scalar_lea.hbm %s962_s2, 256 }
 0x174   : > { %p643_p9 = scmp.ne.s32.totalorder %s913_s6, %s642_s23  ;;  %p647_p7 = scmp.lt.u32.totalorder %s913_s6, %s962_s2 }
 0x175   : > { %p648_p3 = scmp.lt.u32.totalorder %s646_s3, %s642_s23  ;;  %p650_p4 = scmp.lt.u32.totalorder %s642_s23, %s913_s6 }
 0x176   : > { %p644_p1 = pnand %p643_p9, %p835_p10 }
 0x177   : > { %p649_p13 = por %p648_p3, %p647_p7 }
 0x178   : > { %p645_p2 = pneg %p644_p1 }
 0x179   : > { %p651_p6 = por %p650_p4, %p649_p13 }
 0x17b   : > { %p652_p8 = pnand %p651_p6, %p645_p2 }
 0x17d   : > { %655 = shalt.err (!%p652_p8)
}
 0x17e   : > { %498 = dma.vmem_to_hbm [thread:$0]  (%p835_p10), %s908_s19, 128, %s913_s6, %s297_s7  }
 0x17f PF: > { %s322_s15 = sand.u32 1, %s694_s9   ;;  %p980_p12 = scmp.ne.s32.totalorder %s970_s20, 0 }
 0x180   : > { %p981_p11 = scmp.ge.s32.totalorder %s714_s14, 2  ;;  %s323_s16 = scalar_lea.sflag [#allocation5], %s322_s15 }
 0x182   : > { %p509_p0 = pnand %p981_p11, %p980_p12 }
 0x184   : > { %689 = dma.done.wait (!%p509_p0), %s323_s16, 128  }
 0x185   : > { %691 = vsyncadd (!%p509_p0), %s323_s16, 4294967168  ;;  %s19_s14 = sadd.s32 1, %s714_s14   ;;  %s982_s9 = smov %s698_s10 }
 0x186   : > { %p16_p5 = scmp.ge.s32.totalorder %s19_s14, 4   ;;  %s983_s10 = smov %s702_s11 }
 0x187   : > { %s984_s11 = smov %s844_s28  ;;  %s985_s12 = smov %s710_s13 }
 0x188   : > { %s986_s13 = smov %s988_s25  ;;  %18 = sbr.rel (!%p16_p5) target bundleno = 7 (0x7), region = 86 }
 0x18f   :  { %328 = vsyncpa [#allocation4], 1 }
 0x190   :  { %330 = vsyncpa [#allocation4 + $0x1], 1 }
 0x191   :  { %331 = vsyncpa [#allocation7], 1 }
 0x192   :  { %332 = vsyncpa [#allocation5], 1 }
 0x193   :  { %334 = vsyncpa [#allocation5 + $0x1], 1 }

</bundles_post_ra>
